<compile_context>
chip_gen: v6e
topology: v6e:2x2x1
jax: 0.10.0
libtpu: 0.0.40
codegen_flags: <defaults>
</compile_context>

<pallas_src>
import jax
import jax.numpy as jnp
from jax.experimental import pallas as pl
from jax.experimental.pallas import tpu as pltpu


def _round_up(n: int, m: int) -> int:
    return (n + m - 1) // m * m


def belief_update_kernel(x_ref, w1_ref, b1_ref, w2_ref, b2_ref, out_ref):
    """One batch tile of softmax(relu(x @ W1 + b1) @ W2 + b2, axis=-1)."""
    # fc1 on the MXU with f32 accumulation; bias + ReLU in f32 (VPU).
    h = jnp.dot(x_ref[...], w1_ref[...], preferred_element_type=jnp.float32)
    h = jnp.maximum(h + b1_ref[...], 0.0)

    # fc2: narrow back to the weight dtype (bf16 path keeps the bf16 MXU),
    # accumulate in f32, add bias in f32.
    logits = jnp.dot(h.astype(w2_ref.dtype), w2_ref[...],
                     preferred_element_type=jnp.float32) + b2_ref[...]

    # Numerically stable, exactly normalized softmax over the (small) lane axis.
    m = jnp.max(logits, axis=-1, keepdims=True)
    e = jnp.exp(logits - m)
    out_ref[...] = (e / jnp.sum(e, axis=-1, keepdims=True)).astype(out_ref.dtype)


def prepare_params(w1, b1, w2, b2, *, compute_dtype=jnp.float32):
    """One-time parameter prep (hoisted out of the per-call forward):
    cast weights to the MXU compute dtype and reshape biases to (1, n) f32 rows."""
    return (w1.astype(compute_dtype),
            b1.reshape(1, -1).astype(jnp.float32),
            w2.astype(compute_dtype),
            b2.reshape(1, -1).astype(jnp.float32))


def belief_update_forward(x, params, *, block_b=1024):
    """softmax(relu(x @ W1 + b1) @ W2 + b2, axis=1) as one fused Pallas kernel."""
    w1, b1, w2, b2 = params
    compute_dtype = w1.dtype
    B, in_dim = x.shape
    hid, out_dim = w2.shape

    # Batch tile: multiple of the dtype sublane tile (8 f32 / 16 bf16), capped at
    # ~ceil(B/2) so the grid has >= 2 steps whenever the batch allows it
    # (keeps both v7x TensorCores busy); block_b bounds VMEM per step.
    sub = max(8, 32 // jnp.dtype(compute_dtype).itemsize)
    tb = max(sub, min(block_b, _round_up(pl.cdiv(B, 2), sub)))
    grid = (pl.cdiv(B, tb),)   # ragged last tile is handled by Pallas

    x_c = x.astype(compute_dtype)   # no-op for f32; halves x DMA bytes for bf16
    itemsize = jnp.dtype(compute_dtype).itemsize
    cost = pl.CostEstimate(
        flops=2 * B * (in_dim * hid + hid * out_dim),
        transcendentals=B * out_dim,
        bytes_accessed=(B * in_dim * itemsize
                        + (in_dim * hid + hid * out_dim) * itemsize
                        + 4 * (hid + out_dim)
                        + B * out_dim * 4),
    )

    return pl.pallas_call(
        belief_update_kernel,
        out_shape=jax.ShapeDtypeStruct((B, out_dim), jnp.float32),
        grid_spec=pltpu.PrefetchScalarGridSpec(
            num_scalar_prefetch=0,
            grid=grid,
            in_specs=[
                pl.BlockSpec((tb, in_dim),   lambda i: (i, 0)),  # x tile
                pl.BlockSpec((in_dim, hid),  lambda i: (0, 0)),  # W1 (VMEM resident)
                pl.BlockSpec((1, hid),       lambda i: (0, 0)),  # b1 (VMEM resident)
                pl.BlockSpec((hid, out_dim), lambda i: (0, 0)),  # W2 (VMEM resident)
                pl.BlockSpec((1, out_dim),   lambda i: (0, 0)),  # b2 (VMEM resident)
            ],
            out_specs=pl.BlockSpec((tb, out_dim), lambda i: (i, 0)),
        ),
        compiler_params=pltpu.CompilerParams(
            dimension_semantics=("parallel",),   # batch axis shards across TCs (v7x)
        ),
        cost_estimate=cost,
    )(x_c, w1, b1, w2, b2)


def init_params(key, input_dim, hidden_dim, output_dim):
    """Mimics torch.nn.Linear default init: U(-1/sqrt(fan_in), +1/sqrt(fan_in))."""
    k1, k2, k3, k4 = jax.random.split(key, 4)
    bound1 = 1.0 / jnp.sqrt(input_dim)
    bound2 = 1.0 / jnp.sqrt(hidden_dim)
    w1 = jax.random.uniform(k1, (input_dim, hidden_dim), jnp.float32, -bound1, bound1)
    b1 = jax.random.uniform(k2, (hidden_dim,), jnp.float32, -bound1, bound1)
    w2 = jax.random.uniform(k3, (hidden_dim, output_dim), jnp.float32, -bound2, bound2)
    b2 = jax.random.uniform(k4, (output_dim,), jnp.float32, -bound2, bound2)
    return w1, b1, w2, b2


def reference_forward(x, w1, b1, w2, b2):
    h = jnp.maximum(x @ w1 + b1[None, :], 0.0)
    return jax.nn.softmax(h @ w2 + b2[None, :], axis=1)


if __name__ == "__main__":
    batch, input_dim, hidden_dim, output_dim = 8, 16, 32, 8

    key = jax.random.PRNGKey(0)
    kx, kp, kx2 = jax.random.split(key, 3)
    x = jax.random.normal(kx, (batch, input_dim), jnp.float32)
    w1, b1, w2, b2 = init_params(kp, input_dim, hidden_dim, output_dim)

    # --- f32 path: small batch, single grid step --------------------------------
    params_f32 = prepare_params(w1, b1, w2, b2, compute_dtype=jnp.float32)
    out = jax.block_until_ready(belief_update_forward(x, params_f32))
    ref = reference_forward(x, w1, b1, w2, b2)
    assert out.shape == (batch, output_dim)
    assert jnp.allclose(out, ref, atol=2e-3, rtol=2e-3), "f32 mismatch vs reference"
    assert jnp.allclose(jnp.sum(out, axis=1), jnp.ones((batch,)), atol=1e-4)

    # --- bf16 MXU path: large ragged batch (tiling + 2-step grid + ragged tile) --
    big_b = 1000  # not a multiple of the tile: checks the un-padded ragged block
    x_big = jax.random.normal(kx2, (big_b, input_dim), jnp.float32)
    params_bf16 = prepare_params(w1, b1, w2, b2, compute_dtype=jnp.bfloat16)
    out_big = jax.block_until_ready(
        belief_update_forward(x_big, params_bf16, block_b=1024))
    ref_big = reference_forward(x_big, w1, b1, w2, b2)
    assert out_big.shape == (big_b, output_dim)
    assert jnp.allclose(out_big, ref_big, atol=5e-2, rtol=5e-2), "bf16 mismatch"
    assert jnp.allclose(jnp.sum(out_big, axis=1), jnp.ones((big_b,)), atol=1e-4)

    print("KERNEL_OK")
</pallas_src>

<mosaic_0001>
module attributes {stable_mosaic.version = 11 : i64} {
  func.func @belief_update_kernel(%arg0: i32, %arg1: memref<8x16xf32, #tpu.memory_space<vmem>>, %arg2: memref<16x32xf32, #tpu.memory_space<vmem>>, %arg3: memref<1x32xf32, #tpu.memory_space<vmem>>, %arg4: memref<32x8xf32, #tpu.memory_space<vmem>>, %arg5: memref<1x8xf32, #tpu.memory_space<vmem>>, %arg6: memref<8x8xf32, #tpu.memory_space<vmem>>) attributes {dimension_semantics = [#tpu.dimension_semantics<parallel>], iteration_bounds = array<i64: 1>, scalar_prefetch = 0 : i64, scratch_operands = 0 : i64, tpu.core_type = #tpu.core_type<tc>, window_params = [{transform_indices = @transform_0, window_bounds = array<i64: 8, 16>}, {pipeline_mode = #tpu.pipeline_mode<synchronous>, transform_indices = @transform_1, window_bounds = array<i64: 16, 32>}, {pipeline_mode = #tpu.pipeline_mode<synchronous>, transform_indices = @transform_2, window_bounds = array<i64: 1, 32>}, {pipeline_mode = #tpu.pipeline_mode<synchronous>, transform_indices = @transform_3, window_bounds = array<i64: 32, 8>}, {pipeline_mode = #tpu.pipeline_mode<synchronous>, transform_indices = @transform_4, window_bounds = array<i64: 1, 8>}, {transform_indices = @transform_5, window_bounds = array<i64: 8, 8>}]} {
    %c0 = arith.constant 0 : index
    %c0_0 = arith.constant 0 : index
    %0 = vector.load %arg1[%c0, %c0_0] : memref<8x16xf32, #tpu.memory_space<vmem>>, vector<8x16xf32>
    %c0_1 = arith.constant 0 : index
    %c0_2 = arith.constant 0 : index
    %1 = vector.load %arg2[%c0_1, %c0_2] : memref<16x32xf32, #tpu.memory_space<vmem>>, vector<16x32xf32>
    %cst = arith.constant dense<0.000000e+00> : vector<8x32xf32>
    %2 = tpu.matmul %0, %1, %cst {dimension_numbers = #tpu.dot_dimension_numbers<[1], [0], [0], [1], [0, 0, 1, 1], [], []>} : vector<8x16xf32>, vector<16x32xf32>, vector<8x32xf32> -> vector<8x32xf32>
    %c0_3 = arith.constant 0 : index
    %c0_4 = arith.constant 0 : index
    %3 = vector.load %arg3[%c0_3, %c0_4] : memref<1x32xf32, #tpu.memory_space<vmem>>, vector<1x32xf32>
    %4 = vector.broadcast %3 : vector<1x32xf32> to vector<8x32xf32>
    %5 = arith.addf %2, %4 : vector<8x32xf32>
    %cst_5 = arith.constant 0.000000e+00 : f32
    %6 = vector.broadcast %cst_5 : f32 to vector<8x32xf32>
    %7 = arith.maximumf %5, %6 : vector<8x32xf32>
    %c0_6 = arith.constant 0 : index
    %c0_7 = arith.constant 0 : index
    %8 = vector.load %arg4[%c0_6, %c0_7] : memref<32x8xf32, #tpu.memory_space<vmem>>, vector<32x8xf32>
    %cst_8 = arith.constant dense<0.000000e+00> : vector<8x8xf32>
    %9 = tpu.matmul %7, %8, %cst_8 {dimension_numbers = #tpu.dot_dimension_numbers<[1], [0], [0], [1], [0, 0, 1, 1], [], []>} : vector<8x32xf32>, vector<32x8xf32>, vector<8x8xf32> -> vector<8x8xf32>
    %c0_9 = arith.constant 0 : index
    %c0_10 = arith.constant 0 : index
    %10 = vector.load %arg5[%c0_9, %c0_10] : memref<1x8xf32, #tpu.memory_space<vmem>>, vector<1x8xf32>
    %11 = vector.broadcast %10 : vector<1x8xf32> to vector<8x8xf32>
    %12 = arith.addf %9, %11 : vector<8x8xf32>
    %cst_11 = arith.constant dense<0xFF800000> : vector<8xf32>
    %13 = vector.multi_reduction <maximumf>, %12, %cst_11 [1] : vector<8x8xf32> to vector<8xf32>
    %14 = vector.shape_cast %13 : vector<8xf32> to vector<8x1xf32>
    %15 = vector.broadcast %14 : vector<8x1xf32> to vector<8x8xf32>
    %16 = arith.subf %12, %15 : vector<8x8xf32>
    %17 = math.exp %16 : vector<8x8xf32>
    %cst_12 = arith.constant dense<0.000000e+00> : vector<8xf32>
    %18 = vector.multi_reduction <add>, %17, %cst_12 [1] : vector<8x8xf32> to vector<8xf32>
    %19 = vector.shape_cast %18 : vector<8xf32> to vector<8x1xf32>
    %20 = vector.broadcast %19 : vector<8x1xf32> to vector<8x8xf32>
    %21 = arith.divf %17, %20 : vector<8x8xf32>
    %c0_13 = arith.constant 0 : index
    %c0_14 = arith.constant 0 : index
    %22 = vector.load %arg6[%c0_13, %c0_14] : memref<8x8xf32, #tpu.memory_space<vmem>>, vector<8x8xf32>
    tpu.vector_store %arg6[%c0_13, %c0_14], %21 {strides = array<i32>} : memref<8x8xf32, #tpu.memory_space<vmem>>, vector<8x8xf32>,
    return
  }
  func.func @transform_0(%arg0: i32) -> (i32, i32) {
    %c0_i32 = arith.constant 0 : i32
    %c0_i32_0 = arith.constant 0 : i32
    return %arg0, %c0_i32 : i32, i32
  }
  func.func @transform_1(%arg0: i32) -> (i32, i32) {
    %c0_i32 = arith.constant 0 : i32
    %c0_i32_0 = arith.constant 0 : i32
    %c0_i32_1 = arith.constant 0 : i32
    return %c0_i32, %c0_i32_0 : i32, i32
  }
  func.func @transform_2(%arg0: i32) -> (i32, i32) {
    %c0_i32 = arith.constant 0 : i32
    %c0_i32_0 = arith.constant 0 : i32
    %c0_i32_1 = arith.constant 0 : i32
    return %c0_i32, %c0_i32_0 : i32, i32
  }
  func.func @transform_3(%arg0: i32) -> (i32, i32) {
    %c0_i32 = arith.constant 0 : i32
    %c0_i32_0 = arith.constant 0 : i32
    %c0_i32_1 = arith.constant 0 : i32
    return %c0_i32, %c0_i32_0 : i32, i32
  }
  func.func @transform_4(%arg0: i32) -> (i32, i32) {
    %c0_i32 = arith.constant 0 : i32
    %c0_i32_0 = arith.constant 0 : i32
    %c0_i32_1 = arith.constant 0 : i32
    return %c0_i32, %c0_i32_0 : i32, i32
  }
  func.func @transform_5(%arg0: i32) -> (i32, i32) {
    %c0_i32 = arith.constant 0 : i32
    %c0_i32_0 = arith.constant 0 : i32
    return %arg0, %c0_i32 : i32, i32
  }
}

</mosaic_0001>

<bundles_post_ra>
// kernel: tpu_custom_call.1
= control target key start
LH: loop header
LB: loop body
LE: loop exit
PB: predicated region body
PF: predicated region fallthrough
CT: control target
= control target key end

     0   :  { %v277_v1 = vmov 0.0   ;;  %vm278_vm0 = vmmov 0   ;;  %s343_s0 = inlined_call_operand.vmem [shape: f32[8,16], index: 0, kind: input, shape index: {}]   ;;  %s344_s1 = inlined_call_operand.vmem [shape: f32[16,32], index: 1, kind: input, shape index: {}]   ;;  %s345_s2 = inlined_call_operand.vmem [shape: f32[1,32], index: 2, kind: input, shape index: {}]   ;;  %s346_s3 = inlined_call_operand.vmem [shape: f32[32,8], index: 3, kind: input, shape index: {}]   ;;  %s347_s4 = inlined_call_operand.vmem [shape: f32[1,8], index: 4, kind: input, shape index: {}]   ;;  %s348_s5 = inlined_call_operand.hbm [shape: f32[8,8], index: 5, kind: output, shape index: {}]  }
   0x1   :  { %v23_v0 = vld [vmem:[%s344_s1 + $0x8] sm:$0xff]  ;;  %230 = vmatprep.subr.mxu0 %v277_v1  ;;  %v22_v2 = vld [vmem:[%s344_s1] sm:$0xff]  ;;  %234 = vmatprep.mubr.msk.f32.mxu0 %vm278_vm0, %v277_v1  ;;  %v109_v3 = vld [vmem:[%s346_s3 + $0x18] sm:$0xff] }
   0x2   :  { %10 = vsyncpa [#allocation3], 0  ;;  %231 = vmatpush3.msra.mxu0 %v23_v0  ;;  %v21_v4 = vld [vmem:[%s343_s0] sm:$0xff]  ;;  %vm31_vm1 = vcmask 130048   ;;  %237 = vmatprep.subr.mxu1 %v277_v1  ;;  %v108_v5 = vld [vmem:[%s346_s3 + $0x10] sm:$0xff]  ;;  %vm117_vm2 = vcmask 261120  }
   0x3   :  { %232 = vmatprep.subr.mxu0 %v277_v1  ;;  %238 = vmatpush3.msra.mxu1 %v109_v3  ;;  %v107_v6 = vld [vmem:[%s346_s3 + $0x8] sm:$0xff]  ;;  %v106_v7 = vld [vmem:[%s346_s3] sm:$0xff]  ;;  %vm191_vm3 = vcmask 64512  }
   0x4   :  { %233 = vmatpush3.msra.mxu0 %v22_v2  ;;  %239 = vmatprep.subr.mxu1 %v277_v1  ;;  %v218_v8 = vld [vmem:[%s345_s2] ss:$0 sm:$0xff]  ;;  %s279_s2 = smov [#allocation2]  }
   0x5   :  { %235 = vmatmul.mubr.msk.f32.vlgmr.msra.gmra.mxu0 %vm31_vm1, %v21_v4  ;;  %245 = vmatprep.mubr.msk.f32.mxu1 %vm278_vm0, %v277_v1  ;;  %v220_v13 = vld [vmem:[%s347_s4] ss:$0 sm:$0xff]  ;;  %s210_s3 = sshll.u32 %s279_s2, 4  ;;  %s211_s3 = int_to_ptr.vmem [resolvable:$true] %s210_s3 }
   0x6   :  { %240 = vmatpush3.msra.mxu1 %v108_v5  ;;  %s255_s4 = scalar_lea.vmem %s211_s3, 128  ;;  %p260_p1 = scmp.lt.s32.totalorder %s211_s3, %s211_s3 }
   0x7   :  { %241 = vmatprep.subr.mxu1 %v277_v1  ;;  %p256_p0 = scmp.ne.s32.totalorder %s211_s3, %s255_s4  ;;  %p261_p2 = scmp.lt.s32.totalorder %s255_s4, %s255_s4 }
   0x8   :  { %242 = vmatpush3.msra.mxu1 %v107_v6 }
   0x9   :  { %243 = vmatprep.subr.mxu1 %v277_v1  ;;  %p262_p3 = por %p261_p2, %p260_p1 }
   0xa   :  { %244 = vmatpush3.msra.mxu1 %v106_v7 }
   0xb   :  { %p263_p4 = pnand %p262_p3, %p256_p0 }
  0xc5   :  { %v101_v9 = vpop.f32.mrf.mxu0 }
  0xc6   :  { %v102_v10 = vadd.f32 %v218_v8, %v101_v9 }
  0xc7   :  { %v236_v11 = vpop.f32.mrf.mxu0 }
  0xc8   :  { %v105_v12 = vmax.f32 %v102_v10, 0.0 }
  0xca   :  { %246 = vmatmul.mubr.msk.f32.vlgmr.msra.gmra.mxu1 %vm117_vm2, %v105_v12 }
 0x18a   :  { %v187_v14 = vpop.f32.mrf.mxu1 }
 0x18b   :  { %v188_v15 = vadd.f32 %v220_v13, %v187_v14 }
 0x18c   :  { %v247_v16 = vpop.f32.mrf.mxu1 }
 0x18d   :  { %v192_v17 = vsel %vm191_vm3, %v188_v15, -inf }
 0x18e   :  { %193 = vmax.xlane.f32.xlu0 %v192_v17 }
 0x217   :  { %v194_v18 = vpop.xlane.xlu0 %193 }
 0x218   :  { %v195_v19 = vsub.f32 %v188_v15, %v194_v18 }
 0x21a   :  { %v196_v20 = vmul.f32 1.442695, %v195_v19 }
 0x21c   :  { %251 = vpow2.f32 %v196_v20 }
 0x229   :  { %v252_v21 = vpop.eup %251 }
 0x22a   :  { %v198_v22 = vsel %vm191_vm3, %v252_v21, 0.0 }
 0x22b   :  { %199 = vadd.xlane.f32.xlu0 %v198_v22 }
 0x2b4   :  { %v200_v23 = vpop.xlane.xlu0 %199 }
 0x2b5   :  { %253 = vrcp.f32 %v200_v23 }
 0x2c2   :  { %v254_v24 = vpop.eup %253 }
 0x2c3   :  { %v202_v25 = vmul.f32 %v254_v24, %v252_v21 }
 0x2c5   :  { %203 = vst.msk [vmem:[#allocation2] sm:$0xff] %vm191_vm3, %v202_v25 }
 0x2c6   :  { %266 = shalt.err (!%p263_p4)
}
 0x2c7   :  { %213 = dma.vmem_to_hbm [thread:$0]  %s211_s3, 128, %s348_s5, [#allocation3]  }
 0x2c8   :  { %275 = dma.done.wait [#allocation3], 128  }
 0x2c9   :  { %276 = vsyncadd [#allocation3], 4294967168 }
 0x2ca   :  { %217 = vsyncpa [#allocation3], 1 }

</bundles_post_ra>
